<compile_context>
chip_gen: v7x
topology: tpu7x:2x2x1
jax: 0.10.0
libtpu: 0.0.40
codegen_flags: <defaults>
</compile_context>

<pallas_src>
import functools

import jax
import jax.numpy as jnp
from jax.experimental import pallas as pl
from jax.experimental.pallas import tpu as pltpu


def _l_exp2_kernel(pwT_ref, x_ref, y_ref, o_ref, acc_ref, *, patch, n_chan):
    # pwT_ref: (W, Wp)        f32 W-pooling matrix, entries 1/(C*patch^2) (resident)
    # x_ref  : (TB, C, TH, W) block of x
    # y_ref  : (TB, TH, W)    block of y (channel dim squeezed by BlockSpec)
    # o_ref  : (1, 8, 128)    f32 lane-dense per-batch-block result tile
    # acc_ref: (TB*THp, Wp)   f32 elementwise accumulator scratch
    h = pl.program_id(1)

    @pl.when(h == 0)
    def _():
        acc_ref[...] = jnp.zeros_like(acc_ref)

    x = x_ref[...].astype(jnp.float32)                    # (TB, C, TH, W)
    y = y_ref[...].astype(jnp.float32)                    # (TB, TH, W)

    # s = C * (mean_c(x) - y); the 1/C is folded into the pooling matrix.
    s = jnp.sum(x, axis=1) - jnp.float32(n_chan) * y      # (TB, TH, W)

    tb, th, w = s.shape
    d2 = s.reshape(tb * th, w)                             # lane dim untouched

    # Width pooling (and the full 1/(C*patch^2) normalization) on the MXU.
    t = jnp.dot(d2, pwT_ref[...], preferred_element_type=jnp.float32)   # (TB*TH, Wp)

    # Height pooling: plain sum over groups of `patch` consecutive rows.
    # TH % patch == 0, so groups never straddle batch elements.
    wp = t.shape[1]
    p = t.reshape(tb * (th // patch), patch, wp).sum(axis=1)            # (TB*THp, Wp)

    # Elementwise accumulation; the scalar reduce is deferred to the last step.
    acc_ref[...] += p * p

    @pl.when(h == pl.num_programs(1) - 1)
    def _():
        total = jnp.sum(acc_ref[...])
        o_ref[...] = jnp.broadcast_to(total, o_ref.shape).astype(jnp.float32)


def _divisors(n):
    return [d for d in range(1, n + 1) if n % d == 0]


def _round_up(n, m):
    return ((n + m - 1) // m) * m


def _choose_tiles(B, C, H, W, patch, itemsize):
    """Pick (TB, TH): x block ~<= 4 MiB, TH patch/8-aligned, >= 2 batch blocks."""
    target = 4 * 1024 * 1024
    # H tile: must divide H, be a multiple of patch, and be a multiple of 8
    # (or the full H) to satisfy the (8,128) BlockSpec rule exactly.
    cands = [t for t in _divisors(H)
             if t % patch == 0 and (t % 8 == 0 or t == H)]
    fitting = [t for t in cands if C * t * W * itemsize <= target]
    # TODO(synk): for extreme C*W even the smallest candidate may not fit the
    # VMEM budget; such shapes would additionally need a W split.
    th = max(fitting) if fitting else min(cands)

    # Batch tile: largest divisor of B that fits the target, preferring >= 2
    # (ideally an even number of) batch blocks so the "parallel" grid axis can
    # shard across both v7x TensorCores.
    b_divs = sorted(_divisors(B), reverse=True)
    fit_b = [d for d in b_divs if d * C * th * W * itemsize <= target] or [1]
    even_nb = [d for d in fit_b if (B // d) >= 2 and (B // d) % 2 == 0]
    multi_nb = [d for d in fit_b if (B // d) >= 2]
    tb = (even_nb or multi_nb or fit_b)[0]
    return tb, th


def l_exp2(x, y, patch_size):
    """x: (B, C, H, W), y: (B, 1, H, W). Returns scalar f32 loss."""
    B, C, H, W = x.shape
    assert y.shape == (B, 1, H, W)
    # TODO(synk): PyTorch AvgPool2d silently drops a non-divisible remainder;
    # here we require exact divisibility.
    assert H % patch_size == 0 and W % patch_size == 0

    x_isz = jnp.dtype(x.dtype).itemsize
    y_isz = jnp.dtype(y.dtype).itemsize
    tb, th = _choose_tiles(B, C, H, W, patch_size, x_isz)
    nb, nh = B // tb, H // th
    thp, wp = th // patch_size, W // patch_size

    # W-pooling matrix built once in the wrapper (resident in VMEM).  The
    # channel mean's 1/C and both 1/patch factors are folded into it; the
    # H pooling inside the kernel is then a plain group-sum.
    scale = 1.0 / (C * patch_size * patch_size)
    pwT = jnp.where(
        (jnp.arange(W)[:, None] // patch_size) == jnp.arange(wp)[None, :],
        scale, 0.0).astype(jnp.float32)                            # (W, Wp)

    # Explicit VMEM budget: double-buffered x/y blocks + residents + scratch.
    x_blk = tb * C * th * W * x_isz
    y_blk = tb * th * W * y_isz
    pwT_b = W * wp * 4
    out_b = 8 * 128 * 4
    acc_b = _round_up(tb * thp, 8) * _round_up(wp, 128) * 4
    need = 2 * (x_blk + y_blk + pwT_b + out_b) + acc_b
    vmem_limit = int(min(40 * 1024 * 1024,
                         max(2 * need + (4 << 20), 16 * 1024 * 1024)))

    kernel = functools.partial(_l_exp2_kernel, patch=patch_size, n_chan=C)

    out = pl.pallas_call(
        kernel,
        out_shape=jax.ShapeDtypeStruct((nb, 8, 128), jnp.float32),
        grid_spec=pltpu.PrefetchScalarGridSpec(
            num_scalar_prefetch=0,
            grid=(nb, nh),
            in_specs=[
                pl.BlockSpec((W, wp), lambda b, h: (0, 0)),
                pl.BlockSpec((tb, C, th, W), lambda b, h: (b, 0, h, 0)),
                pl.BlockSpec((tb, pl.Squeezed(), th, W),
                             lambda b, h: (b, 0, h, 0)),
            ],
            out_specs=pl.BlockSpec((1, 8, 128), lambda b, h: (b, 0, 0)),
            scratch_shapes=[pltpu.VMEM((tb * thp, wp), jnp.float32)],
        ),
        compiler_params=pltpu.CompilerParams(
            dimension_semantics=("parallel", "arbitrary"),
            vmem_limit_bytes=vmem_limit),
    )(pwT, x, y)

    hp_total, wp_total = H // patch_size, W // patch_size
    return jnp.sum(out[:, 0, 0]) / (B * hp_total * wp_total)


def _reference(x, y, patch):
    # Plain-JAX reference mirroring the PyTorch forward.
    xm = jnp.mean(x, axis=1, keepdims=True)  # (B,1,H,W)

    def pool(z):
        B, C, H, W = z.shape
        z = z.reshape(B, C, H // patch, patch, W // patch, patch)
        return z.mean(axis=(3, 5))

    mx = pool(xm)
    my = pool(y)
    return jnp.mean((mx - my) ** 2)


if __name__ == "__main__":
    key = jax.random.PRNGKey(0)
    k1, k2 = jax.random.split(key)

    B, C, H, W = 2, 4, 16, 16
    patch = 4

    x = jax.random.uniform(k1, (B, C, H, W), dtype=jnp.float32)
    y = jax.random.uniform(k2, (B, 1, H, W), dtype=jnp.float32)

    d = l_exp2(x, y, patch)
    d = jax.block_until_ready(d)

    d_ref = _reference(x, y, patch)
    assert jnp.allclose(d, d_ref, rtol=1e-5, atol=1e-6), (d, d_ref)

    print("KERNEL_OK")
</pallas_src>

<mosaic_0001>
module attributes {stable_mosaic.version = 11 : i64} {
  func.func @_l_exp2_kernel(%arg0: i32, %arg1: i32, %arg2: memref<16x4xf32, #tpu.memory_space<vmem>>, %arg3: memref<1x4x16x16xf32, #tpu.memory_space<vmem>>, %arg4: memref<1x1x16x16xf32, #tpu.memory_space<vmem>>, %arg5: memref<1x8x128xf32, #tpu.memory_space<vmem>>, %arg6: memref<4x4xf32, #tpu.memory_space<vmem>>) attributes {dimension_semantics = [#tpu.dimension_semantics<parallel>, #tpu.dimension_semantics<arbitrary>], iteration_bounds = array<i64: 2, 1>, scalar_prefetch = 0 : i64, scratch_operands = 1 : i64, tpu.core_type = #tpu.core_type<tc>, window_params = [{pipeline_mode = #tpu.pipeline_mode<synchronous>, transform_indices = @transform_0, window_bounds = array<i64: 16, 4>}, {transform_indices = @transform_1, window_bounds = array<i64: 1, 4, 16, 16>}, {transform_indices = @transform_2, window_bounds = array<i64: 1, 1, 16, 16>}, {transform_indices = @transform_3, window_bounds = array<i64: 1, 8, 128>}]} {
    %c0_i32 = arith.constant 0 : i32
    %0 = arith.cmpi eq, %arg1, %c0_i32 : i32
    %1 = arith.extui %0 : i1 to i32
    %c0_i32_0 = arith.constant 0 : i32
    %2 = arith.cmpi ne, %1, %c0_i32_0 : i32
    scf.if %2 {
      %cst_19 = arith.constant 0.000000e+00 : f32
      %22 = vector.broadcast %cst_19 : f32 to vector<4x4xf32>
      %c0_20 = arith.constant 0 : index
      %c0_21 = arith.constant 0 : index
      %23 = vector.load %arg6[%c0_20, %c0_21] : memref<4x4xf32, #tpu.memory_space<vmem>>, vector<4x4xf32>
      tpu.vector_store %arg6[%c0_20, %c0_21], %22 {strides = array<i32>} : memref<4x4xf32, #tpu.memory_space<vmem>>, vector<4x4xf32>,
    } else {
    }
    %c0 = arith.constant 0 : index
    %c0_1 = arith.constant 0 : index
    %c0_2 = arith.constant 0 : index
    %c0_3 = arith.constant 0 : index
    %3 = vector.load %arg3[%c0, %c0_1, %c0_2, %c0_3] : memref<1x4x16x16xf32, #tpu.memory_space<vmem>>, vector<1x4x16x16xf32>
    %c0_4 = arith.constant 0 : index
    %c0_5 = arith.constant 0 : index
    %c0_6 = arith.constant 0 : index
    %c0_7 = arith.constant 0 : index
    %4 = vector.load %arg4[%c0_4, %c0_5, %c0_6, %c0_7] : memref<1x1x16x16xf32, #tpu.memory_space<vmem>>, vector<1x1x16x16xf32>
    %5 = vector.shape_cast %4 : vector<1x1x16x16xf32> to vector<1x16x16xf32>
    %cst = arith.constant dense<0.000000e+00> : vector<1x16x16xf32>
    %6 = vector.multi_reduction <add>, %3, %cst [1] : vector<1x4x16x16xf32> to vector<1x16x16xf32>
    %cst_8 = arith.constant 4.000000e+00 : f32
    %7 = vector.broadcast %cst_8 : f32 to vector<1x16x16xf32>
    %8 = arith.mulf %7, %5 : vector<1x16x16xf32>
    %9 = arith.subf %6, %8 : vector<1x16x16xf32>
    %10 = vector.shape_cast %9 : vector<1x16x16xf32> to vector<16x16xf32>
    %c0_9 = arith.constant 0 : index
    %c0_10 = arith.constant 0 : index
    %11 = vector.load %arg2[%c0_9, %c0_10] : memref<16x4xf32, #tpu.memory_space<vmem>>, vector<16x4xf32>
    %cst_11 = arith.constant dense<0.000000e+00> : vector<16x4xf32>
    %12 = tpu.matmul %10, %11, %cst_11 {dimension_numbers = #tpu.dot_dimension_numbers<[1], [0], [0], [1], [0, 0, 1, 1], [], []>} : vector<16x16xf32>, vector<16x4xf32>, vector<16x4xf32> -> vector<16x4xf32>
    %13 = vector.shape_cast %12 : vector<16x4xf32> to vector<4x4x4xf32>
    %cst_12 = arith.constant dense<0.000000e+00> : vector<4x4xf32>
    %14 = vector.multi_reduction <add>, %13, %cst_12 [1] : vector<4x4x4xf32> to vector<4x4xf32>
    %c0_13 = arith.constant 0 : index
    %c0_14 = arith.constant 0 : index
    %15 = vector.load %arg6[%c0_13, %c0_14] : memref<4x4xf32, #tpu.memory_space<vmem>>, vector<4x4xf32>
    %16 = arith.mulf %14, %14 : vector<4x4xf32>
    %17 = arith.addf %15, %16 : vector<4x4xf32>
    %c0_15 = arith.constant 0 : index
    %c0_16 = arith.constant 0 : index
    %18 = vector.load %arg6[%c0_15, %c0_16] : memref<4x4xf32, #tpu.memory_space<vmem>>, vector<4x4xf32>
    tpu.vector_store %arg6[%c0_15, %c0_16], %17 {strides = array<i32>} : memref<4x4xf32, #tpu.memory_space<vmem>>, vector<4x4xf32>,
    %c0_i32_17 = arith.constant 0 : i32
    %19 = arith.cmpi eq, %arg1, %c0_i32_17 : i32
    %20 = arith.extui %19 : i1 to i32
    %c0_i32_18 = arith.constant 0 : i32
    %21 = arith.cmpi ne, %20, %c0_i32_18 : i32
    scf.if %21 {
      %c0_19 = arith.constant 0 : index
      %c0_20 = arith.constant 0 : index
      %22 = vector.load %arg6[%c0_19, %c0_20] : memref<4x4xf32, #tpu.memory_space<vmem>>, vector<4x4xf32>
      %23 = vector.shape_cast %22 : vector<4x4xf32> to vector<1x4x4xf32>
      %cst_21 = arith.constant dense<0.000000e+00> : vector<1xf32>
      %24 = vector.multi_reduction <add>, %23, %cst_21 [1, 2] : vector<1x4x4xf32> to vector<1xf32>
      %25 = vector.shape_cast %24 : vector<1xf32> to vector<1x1x1xf32>
      %26 = vector.extract %25[0, 0, 0] : f32 from vector<1x1x1xf32>
      %27 = vector.broadcast %26 : f32 to vector<1x8x128xf32>
      %c0_22 = arith.constant 0 : index
      %c0_23 = arith.constant 0 : index
      %c0_24 = arith.constant 0 : index
      %28 = vector.load %arg5[%c0_22, %c0_23, %c0_24] : memref<1x8x128xf32, #tpu.memory_space<vmem>>, vector<1x8x128xf32>
      tpu.vector_store %arg5[%c0_22, %c0_23, %c0_24], %27 {strides = array<i32>} : memref<1x8x128xf32, #tpu.memory_space<vmem>>, vector<1x8x128xf32>,
    } else {
    }
    return
  }
  func.func @transform_0(%arg0: i32, %arg1: i32) -> (i32, i32) {
    %c0_i32 = arith.constant 0 : i32
    %c0_i32_0 = arith.constant 0 : i32
    %c0_i32_1 = arith.constant 0 : i32
    return %c0_i32, %c0_i32_0 : i32, i32
  }
  func.func @transform_1(%arg0: i32, %arg1: i32) -> (i32, i32, i32, i32) {
    %c0_i32 = arith.constant 0 : i32
    %c0_i32_0 = arith.constant 0 : i32
    %c0_i32_1 = arith.constant 0 : i32
    return %arg0, %c0_i32, %arg1, %c0_i32_0 : i32, i32, i32, i32
  }
  func.func @transform_2(%arg0: i32, %arg1: i32) -> (i32, i32, i32, i32) {
    %c0_i32 = arith.constant 0 : i32
    %c0_i32_0 = arith.constant 0 : i32
    %c0_i32_1 = arith.constant 0 : i32
    return %arg0, %c0_i32, %arg1, %c0_i32_0 : i32, i32, i32, i32
  }
  func.func @transform_3(%arg0: i32, %arg1: i32) -> (i32, i32, i32) {
    %c0_i32 = arith.constant 0 : i32
    %c0_i32_0 = arith.constant 0 : i32
    %c0_i32_1 = arith.constant 0 : i32
    return %arg0, %c0_i32, %c0_i32_0 : i32, i32, i32
  }
}

</mosaic_0001>

<bundles_post_ra>
// kernel: tpu_custom_call.1
= control target key start
LH: loop header
LB: loop body
LE: loop exit
PB: predicated region body
PF: predicated region fallthrough
CT: control target
= control target key end

     0   :  { %8 = vsyncpa [#allocation4], 0  ;;  %s1095_s0 = inlined_call_operand.vmem [shape: f32[16,4], index: 0, kind: input, shape index: {}]   ;;  %s1096_s1 = inlined_call_operand.hbm [shape: f32[2,4,16,16], index: 1, kind: input, shape index: {}]   ;;  %s1097_s2 = inlined_call_operand.hbm [shape: f32[2,1,16,16], index: 2, kind: input, shape index: {}]   ;;  %s1098_s3 = inlined_call_operand.hbm [shape: f32[2,8,128], index: 3, kind: output, shape index: {}]  }
   0x1   :  { %10 = vsyncpa [#allocation4 + $0x1], 0 }
   0x2   :  { %11 = vsyncpa [#allocation7], 0 }
   0x3   :  { %13 = vsyncpa [#allocation7 + $0x1], 0 }
   0x4   :  { %14 = vsyncpa [#allocation5], 0 }
   0x5   :  { %16 = vsyncpa [#allocation5 + $0x1], 0  ;;  %s842_s12 = smov 0   ;;  %s844_s13 = smov 0  }
   0x6   :  { %s846_s14 = smov 0   ;;  %s848_s15 = smov 0  }
   0x7   :  { %s850_s16 = smov 0   ;;  %s852_s17 = smov 0  }
   0x8 LB: > { %s559_s18 = sadd.s32 4294967295, %s814_s17   ;;  %s560_s19 = sadd.s32 4294967294, %s814_s17   ;;  %s814_s17 = sphi %s852_s17, %s22_s17   ;;  %s810_s16 = sphi %s850_s16, %s1116_s16   ;;  %s806_s15 = sphi %s848_s15, %s1115_s15   ;;  %s802_s14 = sphi %s846_s14, %s1114_s14   ;;  %s798_s13 = sphi %s844_s13, %s1113_s13   ;;  %s794_s12 = sphi %s842_s12, %s1112_s12  }
   0x9   : > { %s34_s20 = sadd.s32 1, %s810_s16  ;;  %s64_s21 = sadd.s32 1, %s802_s14 }
   0xa   : > { %p36_p0 = scmp.ge.s32.totalorder %s34_s20, 2  ;;  %p71_p1 = scmp.ne.s32.totalorder %s802_s14, %s798_s13 }
   0xb   : > { %p72_p2 = scmp.eq.s32.totalorder %s814_s17, 0  ;;  %p77_p3 = scmp.ne.s32.totalorder %s798_s13, %s794_s12 }
   0xc   : > { %s1118_s20 = smov (%p36_p0, %s34_s20), 0  ;;  %p78_p5 = scmp.eq.s32.totalorder %s559_s18, 0 }
   0xd   : > { %p883_p4 = por %p72_p2, %p71_p1  ;;  %s59_s23 = ssub.s32 %s810_s16, %s1118_s20 }
   0xe   : > { %p129_p6 = scmp.eq.s32.totalorder %s559_s18, 1  ;;  %p62_p7 = scmp.eq.s32.totalorder %s59_s23, 0 }
   0xf   : > { %p889_p8 = por %p78_p5, %p77_p3  ;;  %p135_p10 = scmp.eq.s32.totalorder %s560_s19, 1 }
  0x10   : > { %p893_p9 = por %p129_p6, %p71_p1  ;;  %p615_p13 = scmp.lt.s32.totalorder %s814_s17, 2 }
  0x11   : > { %s1102_s24 = scalar_select %p889_p8, 1, 0 }
  0x12   : > { %s1103_s25 = scalar_select %p893_p9, 1, 0 }
  0x13   : > { %s898_s26 = scalar_select %p62_p7, %s802_s14, %s64_s21  }
  0x14   : > { %p900_p11 = por %p135_p10, %p77_p3  ;;  %s907_s28 = sand.u32 1, %s802_s14  }
  0x15   : > { %s563_s29 = sshll.u32 %s907_s28, 6  ;;  %s579_s30 = sshll.u32 %s810_s16, 10 }
  0x16   : > { %s1104_s27 = scalar_select %p900_p11, 1, 0 }
  0x17   : > { %s914_s6 = scalar_lea.hbm %s1096_s1, %s579_s30  ;;  %s162_s7 = scalar_lea.vmem [#allocation3], %s563_s29 }
  0x18   : > { %s171_s8 = sshll.u32 %s162_s7, 4  ;;  %p920_p0 = pnand %p615_p13, %p883_p4  ;;  %s916_s8 = int_to_ptr.vmem [resolvable:$true] %s171_s8 }
  0x19   : > { %s159_s10 = scalar_lea.sflag [#allocation4], %s907_s28  ;;  %s668_s11 = scalar_lea.hbm %s914_s6, 1024 }
  0x1a   : > { %p669_p2 = scmp.ne.s32.totalorder %s914_s6, %s668_s11  ;;  %p670_p3 = pneg %p920_p0 }
  0x1b   : > { %s673_s21 = scalar_lea.hbm %s1096_s1, 2048  ;;  %p674_p4 = scmp.lt.u32.totalorder %s914_s6, %s1096_s1 }
  0x1c   : > { %p671_p5 = pnand %p670_p3, %p669_p2  ;;  %p675_p7 = scmp.lt.u32.totalorder %s673_s21, %s668_s11 }
  0x1d   : > { %p677_p13 = scmp.lt.u32.totalorder %s668_s11, %s914_s6 }
  0x1e   : > { %p672_p6 = pneg %p671_p5  ;;  %p676_p10 = por %p675_p7, %p674_p4 }
  0x20   : > { %p678_p12 = por %p677_p13, %p676_p10 }
  0x22   : > { %p679_p1 = pnand %p678_p12, %p672_p6 }
  0x24   : > { %682 = shalt.err (!%p679_p1)
}
  0x25   : > { %s683_s29 = scalar_lea.vmem %s916_s8, 1024  ;;  %s816_s30 = smov [#allocation3]  }
  0x26   : > { %p684_p2 = scmp.ne.s32.totalorder %s916_s8, %s683_s29  ;;  %s688_s4 = sshll.u32 %s816_s30, 4  ;;  %s689_s4 = int_to_ptr.vmem [resolvable:$false] %s688_s4 }
  0x27   : > { %s690_s5 = scalar_lea.vmem %s689_s4, 2048  ;;  %p691_p9 = scmp.lt.s32.totalorder %s916_s8, %s689_s4 }
  0x28   : > { %p686_p5 = pnand %p684_p2, %p670_p3  ;;  %p692_p4 = scmp.lt.s32.totalorder %s690_s5, %s683_s29 }
  0x2a   : > { %p687_p11 = pneg %p686_p5  ;;  %p693_p7 = por %p692_p4, %p691_p9 }
  0x2c   : > { %p694_p10 = pnand %p693_p7, %p687_p11 }
  0x2e   : > { %697 = shalt.err (!%p694_p10)
}
  0x2f   : > { %s817_s7 = smov 128   ;;  %s818_s11 = smov 8  }
  0x30   : > { %607 = dma.hbm_to_vmem [thread:$0]  (!%p920_p0), %s914_s6, 1024, %s916_s8, %s159_s10, %s817_s7, %s817_s7, %s818_s11  }
  0x31   : > { %p202_p9 = scmp.lt.s32.totalorder %s814_s17, 3  ;;  %s566_s18 = sshll.u32 %s907_s28, 4 }
  0x32   : > { %s580_s19 = sshll.u32 %s810_s16, 8  ;;  %p1106_p11 = scmp.ge.s32.totalorder %s814_s17, 1 }
  0x33   : > { %s968_s29 = scalar_lea.hbm %s1097_s2, %s580_s19  ;;  %s185_s30 = scalar_lea.vmem [#allocation6], %s566_s18 }
  0x34   : > { %p961_p12 = pnand %p1106_p11, %p202_p9  ;;  %s194_s4 = sshll.u32 %s185_s30, 4  ;;  %s970_s4 = int_to_ptr.vmem [resolvable:$true] %s194_s4 }
  0x35   : > { %s182_s6 = scalar_lea.sflag [#allocation7], %s907_s28  ;;  %s698_s8 = scalar_lea.hbm %s968_s29, 256 }
  0x36   : > { %p699_p1 = scmp.ne.s32.totalorder %s968_s29, %s698_s8  ;;  %s703_s19 = scalar_lea.hbm %s1097_s2, 512 }
  0x37   : > { %p704_p2 = scmp.lt.u32.totalorder %s968_s29, %s1097_s2  ;;  %p705_p5 = scmp.lt.u32.totalorder %s703_s19, %s698_s8 }
  0x38   : > { %p701_p6 = pnand %p699_p1, %p670_p3  ;;  %p707_p7 = scmp.lt.u32.totalorder %s698_s8, %s968_s29 }
  0x39   : > { %p706_p4 = por %p705_p5, %p704_p2 }
  0x3a   : > { %p702_p13 = pneg %p701_p6 }
  0x3b   : > { %p708_p10 = por %p707_p7, %p706_p4 }
  0x3d   : > { %p709_p9 = pnand %p708_p10, %p702_p13 }
  0x3f   : > { %712 = shalt.err (!%p709_p9)
}
  0x40   : > { %s713_s18 = scalar_lea.vmem %s970_s4, 256  ;;  %s819_s30 = smov [#allocation6]  }
  0x41   : > { %p714_p11 = scmp.ne.s32.totalorder %s970_s4, %s713_s18  ;;  %s718_s10 = sshll.u32 %s819_s30, 4  ;;  %s719_s10 = int_to_ptr.vmem [resolvable:$false] %s718_s10 }
  0x42   : > { %s720_s5 = scalar_lea.vmem %s719_s10, 512  ;;  %p721_p8 = scmp.lt.s32.totalorder %s970_s4, %s719_s10 }
  0x43   : > { %p716_p1 = pnand %p714_p11, %p670_p3  ;;  %p722_p2 = scmp.lt.s32.totalorder %s720_s5, %s713_s18 }
  0x45   : > { %p717_p6 = pneg %p716_p1  ;;  %p723_p5 = por %p722_p2, %p721_p8 }
  0x47   : > { %p724_p4 = pnand %p723_p5, %p717_p6 }
  0x49   : > { %727 = shalt.err (!%p724_p4)
}
  0x4a   : > { %610 = dma.hbm_to_vmem [thread:$0]  (!%p920_p0), %s968_s29, 256, %s970_s4, %s182_s6, %s817_s7, %s817_s7, %s818_s11  }
  0x4b   : > { %206 = sbr.rel (%p961_p12) target bundleno = 561 (0x231), region = 32  ;;  %s1004_s8 = sand.u32 (!%p961_p12), 1, %s798_s13  }
  0x4c   : > { %s570_s19 = sshll.u32 (!%p961_p12), %s1004_s8, 6  ;;  %s209_s22 = scalar_lea.sflag (!%p961_p12), [#allocation4], %s1004_s8 }
  0x4d   : > { %s212_s9 = scalar_lea.vmem (!%p961_p12), [#allocation3], %s570_s19  ;;  %p1108_p8 = scmp.ne.s32.totalorder (!%p961_p12), %s1102_s24, 0 }
  0x52   : > { %781 = dma.done.wait (%p1108_p8), %s209_s22, 1024  }
  0x53   : > { %783 = vsyncadd (%p1108_p8), %s209_s22, 4294966272  ;;  %s571_s28 = sshll.u32 %s1004_s8, 4  ;;  %s218_s7 = scalar_lea.sflag [#allocation7], %s1004_s8 }
  0x54   : > { %s221_s11 = scalar_lea.vmem [#allocation6], %s571_s28 }
  0x55   : > { %785 = dma.done.wait (%p1108_p8), %s218_s7, 256  }
  0x56   : > { %787 = vsyncadd (%p1108_p8), %s218_s7, 4294967040  ;;  %vm255_vm0 = vcmask 27648   ;;  %v820_v0 = vmov 0.0   ;;  %vm267_vm1 = vcmask 130048   ;;  %v286_v1 = vld [vmem:[%s1095_s0] sm:$0xff]  ;;  %v287_v2 = vld [vmem:[%s1095_s0 + $0x8] sm:$0xff] }
  0x57   : > { %256 = vst.msk [vmem:[#allocation2] sm:$0xf] %vm255_vm0, %v820_v0  ;;  %v257_v3 = vld [vmem:[%s212_s9] sm:$0xff]  ;;  %v592_v4 = vpack.c.bf16 %v287_v2, %v286_v1  ;;  %v259_v5 = vld [vmem:[%s212_s9 + $0x10] sm:$0xff]  ;;  %v258_v12 = vld [vmem:[%s212_s9 + $0x8] sm:$0xff]  ;;  %vm413_vm2 = vcmask 1041409  }
  0x58   : > { %v261_v6 = vld [vmem:[%s212_s9 + $0x20] sm:$0xff]  ;;  %v263_v7 = vld [vmem:[%s212_s9 + $0x30] sm:$0xff]  ;;  %v268_v8 = vsel %vm267_vm1, %v257_v3, 0.0  ;;  %v269_v10 = vsel %vm267_vm1, %v259_v5, 0.0  ;;  %v260_v13 = vld [vmem:[%s212_s9 + $0x18] sm:$0xff]  ;;  %v275_v18 = vsel %vm267_vm1, %v258_v12, 0.0 }
  0x59   : > { %v265_v9 = vld [vmem:[%s221_s11] sm:$0xff]  ;;  %v271_v11 = vsel %vm267_vm1, %v261_v6, 0.0  ;;  %593 = vmatprep.subr.bf16.mxu0 %v592_v4  ;;  %v270_v14 = vadd.f32 %v269_v10, %v268_v8  ;;  %v262_v15 = vld [vmem:[%s212_s9 + $0x28] sm:$0xff]  ;;  %v264_v16 = vld [vmem:[%s212_s9 + $0x38] sm:$0xff]  ;;  %v276_v19 = vsel %vm267_vm1, %v260_v13, 0.0  ;;  %v273_v20 = vsel %vm267_vm1, %v263_v7, 0.0 }
  0x5a   : > { %v266_v17 = vld [vmem:[%s221_s11 + $0x8] sm:$0xff]  ;;  %595 = vmatpush3.bf16.msra.mxu0 %v592_v4  ;;  %v277_v21 = vadd.f32 %v276_v19, %v275_v18  ;;  %v278_v22 = vsel %vm267_vm1, %v262_v15, 0.0  ;;  %v282_v24 = vmul.f32 4.0, %v265_v9  ;;  %v280_v25 = vsel %vm267_vm1, %v264_v16, 0.0  ;;  %s572_s24 = sshll.u32 %s1004_s8, 3  ;;  %s576_s30 = sshll.u32 %s806_s15, 7 }
  0x5b   : > { %v272_v23 = vadd.f32 %v271_v11, %v270_v14  ;;  %v283_v27 = vmul.f32 4.0, %v266_v17  ;;  %vm415_vm3 = vcmask 1042434   ;;  %vm417_vm4 = vcmask 1043459   ;;  %s248_s23 = scalar_lea.vmem [#allocation8], %s572_s24  ;;  %s1048_s22 = scalar_lea.hbm %s1098_s3, %s576_s30 }
  0x5c   : > { %v279_v26 = vadd.f32 %v278_v22, %v277_v21  ;;  %s452_s18 = sshll.u32 %s248_s23, 4  ;;  %s439_s9 = scalar_lea.sflag [#allocation5], %s1004_s8  ;;  %s1043_s18 = int_to_ptr.vmem [resolvable:$true] %s452_s18 }
  0x5d   : > { %v274_v28 = vadd.f32 %v273_v20, %v272_v23  ;;  %s728_s28 = scalar_lea.vmem %s1043_s18, 128  ;;  %p1109_p3 = scmp.ne.s32.totalorder %s1103_s25, 0 }
  0x5e   : > { %v281_v29 = vadd.f32 %v280_v25, %v279_v26  ;;  %v404_v4 = vld [vmem:[#allocation2] sm:$0xf]  ;;  %p729_p0 = scmp.ne.s32.totalorder %s1043_s18, %s728_s28  ;;  %s821_s15 = smov [#allocation8]  }
  0x5f   : > { %v284_v30 = vsub.f32 %v274_v28, %v282_v24  ;;  %s732_s7 = sshll.u32 %s821_s15, 4  ;;  %s733_s7 = int_to_ptr.vmem [resolvable:$false] %s732_s7 }
  0x60   : > { %v285_v31 = vsub.f32 %v281_v29, %v283_v27  ;;  %p730_p12 = pnand %p729_p0, %p1109_p3  ;;  %s734_s11 = scalar_lea.vmem %s733_s7, 256 }
  0x61   : > { %589 = vmatprep.mubr.msk.f32.mxu0 %vm267_vm1, %v284_v30  ;;  %p735_p7 = scmp.lt.s32.totalorder %s1043_s18, %s733_s7  ;;  %p736_p10 = scmp.lt.s32.totalorder %s734_s11, %s728_s28 }
  0x62   : > { %590 = vmatmul.mubr.msk.f32.vlgmr.msra.gmra.mrb[0].mxu0 %vm267_vm1, %v285_v31  ;;  %p731_p13 = pneg %p730_p12 }
  0x63   : > { %p737_p9 = por %p736_p10, %p735_p7 }
  0x65   : > { %p738_p11 = pnand %p737_p9, %p731_p13 }
 0x135   : > { %v591_v32 = vpop.f32.mrb[0].mxu0 }
 0x136   : > { %v372_v33 = vcombine.high %v591_v32, %v591_v32  ;;  %v390_v34 = vsel %vm255_vm0, %v591_v32, 0.0  ;;  %v360_v35 = vpop.f32.mrb[1].mxu0 }
 0x137   : > { %v391_v36 = vrot.slane %v390_v34, 4  ;;  %v371_v37 = vcombine.high %v360_v35, %v360_v35  ;;  %v376_v38 = vsel %vm255_vm0, %v360_v35, 0.0 }
 0x138   : > { %v397_v39 = vsel %vm255_vm0, %v372_v33, 0.0  ;;  %v377_v40 = vrot.slane %v376_v38, 4 }
 0x139   : > { %v392_v41 = vadd.f32 %v391_v36, %v390_v34  ;;  %v398_v42 = vrot.slane %v397_v39, 4  ;;  %v383_v43 = vsel %vm255_vm0, %v371_v37, 0.0 }
 0x13a   : > { %v378_v44 = vadd.f32 %v377_v40, %v376_v38  ;;  %v384_v45 = vrot.slane %v383_v43, 4 }
 0x13b   : > { %v393_v46 = vrot.slane %v392_v41, 2  ;;  %v399_v47 = vadd.f32 %v398_v42, %v397_v39 }
 0x13c   : > { %v379_v48 = vrot.slane %v378_v44, 2  ;;  %v385_v49 = vadd.f32 %v384_v45, %v383_v43 }
 0x13d   : > { %v394_v50 = vadd.f32 %v393_v46, %v392_v41  ;;  %v400_v51 = vrot.slane %v399_v47, 2 }
 0x13e   : > { %v380_v52 = vadd.f32 %v379_v48, %v378_v44  ;;  %v386_v53 = vrot.slane %v385_v49, 2 }
 0x13f   : > { %v395_v54 = vrot.slane %v394_v50, 1  ;;  %v401_v55 = vadd.f32 %v400_v51, %v399_v47 }
 0x140   : > { %v381_v56 = vrot.slane %v380_v52, 1  ;;  %v387_v57 = vadd.f32 %v386_v53, %v385_v49 }
 0x141   : > { %v402_v58 = vrot.slane %v401_v55, 1  ;;  %v396_v61 = vadd.f32 %v395_v54, %v394_v50 }
 0x142   : > { %v382_v59 = vadd.f32 %v381_v56, %v380_v52  ;;  %v388_v60 = vrot.slane %v387_v57, 1 }
 0x143   : > { %v403_v62 = vadd.f32 %v402_v58, %v401_v55  ;;  %v407_v2 = vmul.f32 %v396_v61, %v396_v61 }
 0x144   : > { %v389_v63 = vadd.f32 %v388_v60, %v387_v57  ;;  %v405_v0 = vmul.f32 %v382_v59, %v382_v59 }
 0x145   : > { %v408_v3 = vmul.f32 %v403_v62, %v403_v62 }
 0x146   : > { %v406_v1 = vmul.f32 %v389_v63, %v389_v63 }
 0x148   : > { %v414_v5 = vsel %vm413_vm2, %v406_v1, %v405_v0 }
 0x149   : > { %v416_v6 = vsel %vm415_vm3, %v407_v2, %v414_v5 }
 0x14a   : > { %v418_v7 = vsel %vm417_vm4, %v408_v3, %v416_v6 }
 0x14b   : > { %v420_v8 = vadd.f32 %v418_v7, %v404_v4 }
 0x14d   : > { %421 = vst.msk [vmem:[#allocation2] sm:$0xf] %vm255_vm0, %v420_v8 }
 0x154   : > { %v425_v9 = vld [vmem:[#allocation2] sm:$0xf] }
 0x155   : > { %v426_v10 = vsel %vm255_vm0, %v425_v9, 0.0 }
 0x156   : > { %427 = vadd.xlane.f32.xlu0 %v426_v10 }
 0x1e3   : > { %v428_v11 = vpop.xlane.xlu0 %427 }
 0x1e4   : > { %v429_v12 = vrot.slane %v428_v11, 4 }
 0x1e6   : > { %v430_v13 = vadd.f32 %v429_v12, %v428_v11 }
 0x1e8   : > { %v431_v14 = vrot.slane %v430_v13, 2 }
 0x1ea   : > { %v432_v15 = vadd.f32 %v431_v14, %v430_v13 }
 0x1ec   : > { %v433_v16 = vrot.slane %v432_v15, 1 }
 0x1ee   : > { %v434_v17 = vadd.f32 %v433_v16, %v432_v15 }
 0x1f0   : > { %596 = vpush %v434_v17 }
 0x221   : > { %s597_s10 = spop %596 }
 0x222   : > { %v436_v18 = vstv %s597_s10 }
 0x223   : > { %437 = vst [vmem:[%s248_s23] sm:$0xff] %v436_v18 }
 0x224   : > { %741 = shalt.err (!%p738_p11)
}
 0x225   : > { %s742_s8 = scalar_lea.hbm %s1048_s22, 128  ;;  %s746_s4 = scalar_lea.hbm %s1098_s3, 256 }
 0x226   : > { %p743_p1 = scmp.ne.s32.totalorder %s1048_s22, %s742_s8  ;;  %p747_p5 = scmp.lt.u32.totalorder %s1048_s22, %s1098_s3 }
 0x227   : > { %p748_p4 = scmp.lt.u32.totalorder %s746_s4, %s742_s8  ;;  %p750_p0 = scmp.lt.u32.totalorder %s742_s8, %s1048_s22 }
 0x228   : > { %p744_p6 = pnand %p743_p1, %p1109_p3 }
 0x229   : > { %p749_p8 = por %p748_p4, %p747_p5 }
 0x22a   : > { %p745_p2 = pneg %p744_p6 }
 0x22b   : > { %p751_p12 = por %p750_p0, %p749_p8 }
 0x22d   : > { %p752_p13 = pnand %p751_p12, %p745_p2 }
 0x22f   : > { %755 = shalt.err (!%p752_p13)
}
 0x230   : > { %602 = dma.vmem_to_hbm [thread:$0]  (%p1109_p3), %s1043_s18, 128, %s1048_s22, %s439_s9  }
 0x231 PF: > { %s464_s23 = sand.u32 1, %s794_s12   ;;  %p1110_p7 = scmp.ne.s32.totalorder %s1104_s27, 0 }
 0x232   : > { %p1111_p10 = scmp.ge.s32.totalorder %s814_s17, 2  ;;  %s465_s30 = scalar_lea.sflag [#allocation5], %s464_s23 }
 0x234   : > { %p612_p9 = pnand %p1111_p10, %p1110_p7 }
 0x236   : > { %789 = dma.done.wait (!%p612_p9), %s465_s30, 128  }
 0x237   : > { %791 = vsyncadd (!%p612_p9), %s465_s30, 4294967168  ;;  %s22_s17 = sadd.s32 1, %s814_s17   ;;  %s1112_s12 = smov %s798_s13 }
 0x238   : > { %p19_p11 = scmp.ge.s32.totalorder %s22_s17, 4   ;;  %s1113_s13 = smov %s802_s14 }
 0x239   : > { %s1114_s14 = smov %s898_s26  ;;  %s1115_s15 = smov %s810_s16 }
 0x23a   : > { %s1116_s16 = smov %s1118_s20  ;;  %21 = sbr.rel (!%p19_p11) target bundleno = 8 (0x8), region = 98 }
 0x241   :  { %470 = vsyncpa [#allocation4], 1 }
 0x242   :  { %472 = vsyncpa [#allocation4 + $0x1], 1 }
 0x243   :  { %473 = vsyncpa [#allocation7], 1 }
 0x244   :  { %475 = vsyncpa [#allocation7 + $0x1], 1 }
 0x245   :  { %476 = vsyncpa [#allocation5], 1 }
 0x246   :  { %478 = vsyncpa [#allocation5 + $0x1], 1 }

</bundles_post_ra>
